<compile_context>
chip_gen: v5e
topology: v5e:2x2
jax: 0.10.0
libtpu: 0.0.40
codegen_flags: <defaults>
</compile_context>

<pallas_src>
import functools

import numpy as np
import jax
import jax.numpy as jnp
from jax import lax
from jax.experimental import pallas as pl
from jax.experimental.pallas import tpu as pltpu

LANE = 128              # lane width; last dim of the text slab
CHUNK = 32              # in-kernel row chunk (uint8 native sublane tile = (32,128))
TABLE = 256             # byte -> id LUT entries (one per possible byte value)
SMALL_TILE_MAX = 8192   # single-tile path up to this many rows (pow2 buckets)
LARGE_TILE_ROWS = 8192  # rows per grid step on the multi-tile (pipelined) path

_LOWERING_ERRORS = (pltpu.LoweringException, NotImplementedError)


# ------------------------------ Pallas kernels -------------------------------
def _gather_kernel(codes_ref, lut_ref, out_ref):
    """byte -> id lookup as an in-VMEM lane gather.

    codes_ref: (tile_rows, 128) uint8        raw byte codes of the text
    lut_ref:   (8, 128|256)     int32        byte -> vocab id (-1 = unknown),
                                             all 8 sublane rows identical
    out_ref:   (tile_rows, 128) int8/int16   vocab ids
    """
    ascii_only = lut_ref.shape[1] == LANE
    lo_lut = lut_ref[:, 0:LANE]                          # hoisted: loaded once per step
    hi_lut = None if ascii_only else lut_ref[:, LANE:TABLE]
    n_chunks = codes_ref.shape[0] // CHUNK

    def body(c, carry):
        base = pl.multiple_of(c * CHUNK, CHUNK)
        codes32 = codes_ref[pl.ds(base, CHUNK), :].astype(jnp.int32)    # (32,128)
        parts = []
        for r in range(CHUNK // 8):                      # 4 vregs, statically unrolled
            code = codes32[r * 8:(r + 1) * 8, :]         # (8,128) int32
            if ascii_only:
                # host guarantees code < 128: one gather, no mask, no select
                vals = jnp.take_along_axis(lo_lut, code, axis=1)
            else:
                idx = code & (LANE - 1)
                lo = jnp.take_along_axis(lo_lut, idx, axis=1)
                hi = jnp.take_along_axis(hi_lut, idx, axis=1)
                vals = jnp.where(code < LANE, lo, hi)
            parts.append(vals)
        # single narrow store per 32-row chunk (4x fewer vst issues than per-vreg)
        out_ref[pl.ds(base, CHUNK), :] = (
            jnp.concatenate(parts, axis=0).astype(out_ref.dtype))
        return carry

    lax.fori_loop(0, n_chunks, body, 0, unroll=4)


def _select_kernel(codes_ref, out_ref, *, pairs):
    """Fallback lookup without dynamic-gather: unrolled compare/select chain.

    Only used if the running Mosaic build lacks the lane dynamic-gather lowering.
    """
    # TODO(synk): linear chain is ~2*vocab_size VPU ops/element (VALU-bound); a
    # log-depth formulation would be needed to get near mem-bound here.
    n_chunks = codes_ref.shape[0] // CHUNK

    def body(c, carry):
        base = pl.multiple_of(c * CHUNK, CHUNK)
        codes = codes_ref[pl.ds(base, CHUNK), :].astype(jnp.int32)
        ids = jnp.full(codes.shape, -1, jnp.int32)
        for byte_val, tok_id in pairs:
            ids = jnp.where(codes == byte_val, jnp.int32(tok_id), ids)
        out_ref[pl.ds(base, CHUNK), :] = ids.astype(out_ref.dtype)
        return carry

    lax.fori_loop(0, n_chunks, body, 0)


# ------------------------------ kernel builders -------------------------------
@functools.lru_cache(maxsize=None)
def _build_gather_encoder(tile_rows, n_tiles, table_lanes, out_dtype_name):
    padded_rows = tile_rows * n_tiles
    fn = pl.pallas_call(
        _gather_kernel,
        out_shape=jax.ShapeDtypeStruct((padded_rows, LANE), np.dtype(out_dtype_name)),
        grid_spec=pltpu.PrefetchScalarGridSpec(
            num_scalar_prefetch=0,
            grid=(n_tiles,),
            in_specs=[
                pl.BlockSpec((tile_rows, LANE), lambda i: (i, 0)),   # uint8 codes
                pl.BlockSpec((8, table_lanes), lambda i: (0, 0)),    # resident LUT (4-8 KiB)
            ],
            out_specs=pl.BlockSpec((tile_rows, LANE), lambda i: (i, 0)),
        ),
        compiler_params=pltpu.CompilerParams(
            dimension_semantics=("parallel",)),   # megacore split on v7x
    )
    return jax.jit(fn)


@functools.lru_cache(maxsize=None)
def _build_select_encoder(tile_rows, n_tiles, pairs, out_dtype_name):
    padded_rows = tile_rows * n_tiles
    fn = pl.pallas_call(
        functools.partial(_select_kernel, pairs=pairs),
        out_shape=jax.ShapeDtypeStruct((padded_rows, LANE), np.dtype(out_dtype_name)),
        grid_spec=pltpu.PrefetchScalarGridSpec(
            num_scalar_prefetch=0,
            grid=(n_tiles,),
            in_specs=[pl.BlockSpec((tile_rows, LANE), lambda i: (i, 0))],
            out_specs=pl.BlockSpec((tile_rows, LANE), lambda i: (i, 0)),
        ),
        compiler_params=pltpu.CompilerParams(dimension_semantics=("parallel",)),
    )
    return jax.jit(fn)


def _pick_tiling(rows):
    """Return (tile_rows, n_tiles).

    Small inputs: pow2 single-tile buckets from 32 to 8192 rows (no 256K-element
    padding floor). Large inputs: 8192-row tiles with an even, ~1.5x-geometric
    tile count (>= 2 so both v7x TensorCores get work; padding waste <= ~1.5x).
    lru_cache on the builders keeps the compile count bounded.
    """
    if rows <= SMALL_TILE_MAX:
        tile_rows = 1 << max(5, (rows - 1).bit_length())   # >= 32 rows = one chunk
        return min(tile_rows, SMALL_TILE_MAX), 1
    tiles_needed = -(-rows // LARGE_TILE_ROWS)
    tiles = 2
    while tiles < tiles_needed:
        tiles = ((int(tiles * 1.5) + 1) // 2) * 2          # next even bucket, ~1.5x
    return LARGE_TILE_ROWS, tiles


# ----------------------------- CharTransform (JAX) ----------------------------
class CharTransformJAX:
    """JAX/Pallas port of CharTransform (file I/O replaced by in-memory corpus).

    Documented divergences from the torch module:
      * unknown characters encode to -1 instead of raising KeyError (a -1 fed
        into a downstream embedding would silently index the last row);
      * output dtype is the narrowest signed int holding the vocab ids (int8
        here) instead of torch.long -- widen downstream only if needed.
    """

    def __init__(self, data: str):
        self.data = data
        chars = sorted(set(self.data))
        self.data_size = len(self.data)
        self.vocab_size = len(chars)
        print(f"Data has {self.data_size} characters, {self.vocab_size} unique.")
        self.stoi = {ch: i for i, ch in enumerate(chars)}
        self.itos = {i: ch for i, ch in enumerate(chars)}

        # Narrow output dtype: the kernel is HBM-bound and an int32 id stream is
        # ~4/5 of the traffic, so store int8 when ids (+ the -1 sentinel) fit.
        if self.vocab_size <= 127:
            self.out_dtype = jnp.int8
        elif self.vocab_size <= 32767:
            self.out_dtype = jnp.int16
        else:
            self.out_dtype = jnp.int32
        self._out_dtype_name = np.dtype(self.out_dtype).name

        # byte code -> vocab id LUT; unknown bytes map to -1.
        lut = np.full((TABLE,), -1, dtype=np.int32)
        for ch, i in self.stoi.items():
            cp = ord(ch)
            if cp < TABLE:
                lut[cp] = i
        # TODO(synk): vocab characters with code point >= 256 are not
        # representable in the byte-indexed LUT; inputs containing them map to -1.

        max_cp = max((ord(ch) for ch in chars), default=0)
        used = {ord(ch) for ch in chars if ord(ch) < TABLE}
        # ASCII fast path needs a free "unknown" byte below 128.
        self._ascii = max_cp < LANE and any(b not in used for b in range(LANE))
        self._table_lanes = LANE if self._ascii else TABLE
        free = [b for b in range(self._table_lanes) if b not in used]
        self._unk_byte = free[0] if free else 0
        # NOTE: if the vocab covered all 256 byte values there would be no free
        # unknown byte and out-of-range code points would alias vocab id 0.

        # Sublane-broadcast so each 128-wide half is a ready-made (8,128) lane
        # gather source; kept int32 (gather in int32, cast to int8 on store).
        self.lut = jnp.asarray(
            np.broadcast_to(lut[: self._table_lanes], (8, self._table_lanes)).copy())

        self._pairs = tuple(
            (ord(ch), i) for ch, i in self.stoi.items() if ord(ch) < TABLE)
        self._use_gather = None   # None = gather path not probed yet

    def __call__(self, text: str) -> jax.Array:
        return self.encode(text)

    def encode(self, text: str) -> jax.Array:
        n = len(text)
        if n == 0:
            return jnp.zeros((0,), dtype=self.out_dtype)

        # Vectorized host preprocessing: exact unicode code points via utf-32,
        # remap anything the kernel can't look up to the (unknown) byte.
        cps = np.frombuffer(text.encode("utf-32-le", "surrogatepass"), dtype="<u4")
        codes = np.where(cps < np.uint32(self._table_lanes),
                         cps, np.uint32(self._unk_byte)).astype(np.uint8)

        rows = -(-n // LANE)
        tile_rows, n_tiles = _pick_tiling(rows)
        padded_rows = tile_rows * n_tiles
        buf = np.zeros((padded_rows * LANE,), dtype=np.uint8)
        buf[:n] = codes
        codes_2d = jnp.asarray(buf.reshape(padded_rows, LANE))

        ids_2d = self._run(codes_2d, tile_rows, n_tiles)
        # torch returns int64 (Long); we return the narrow kernel dtype.
        return ids_2d.reshape(-1)[:n]

    def _run(self, codes_2d, tile_rows, n_tiles):
        if self._use_gather is not False:
            try:
                fn = _build_gather_encoder(tile_rows, n_tiles,
                                           self._table_lanes, self._out_dtype_name)
                out = fn(codes_2d, self.lut)
                if self._use_gather is None:
                    out = jax.block_until_ready(out)   # surface first-call errors
                    self._use_gather = True
                return out
            except _LOWERING_ERRORS:
                self._use_gather = False
            except Exception as e:  # noqa: BLE001
                msg = str(e).lower()
                if ("unsupported" in msg or "not implemented" in msg
                        or "unimplemented" in msg or "lowering" in msg):
                    # Mosaic build without the lane dynamic-gather lowering.
                    self._use_gather = False
                else:
                    # Transient failures (e.g. OOM) must not silently switch
                    # to the slow compare/select fallback.
                    raise
        fn = _build_select_encoder(tile_rows, n_tiles, self._pairs,
                                   self._out_dtype_name)
        return fn(codes_2d)

    def decode(self, ids) -> str:
        # TODO(synk): string construction is inherently host-side; no Pallas path.
        return "".join(self.itos[int(i)] for i in np.asarray(ids))


# ------------------------------------ main ------------------------------------
if __name__ == "__main__":
    # Deterministic synthetic "data file" (defines the vocabulary).
    corpus = (
        "First Citizen:\n"
        "Before we proceed any further, hear me speak.\n"
        "All:\nSpeak, speak.\n"
    )
    transform = CharTransformJAX(corpus)

    # Small deterministic input: 96 vocab ids sampled with PRNGKey(0) ->
    # exercises the 32-row single-tile bucket (no 256K-element padding floor).
    key = jax.random.PRNGKey(0)
    sample_idx = jax.random.randint(key, (96,), 0, transform.vocab_size)
    text_small = "".join(transform.itos[int(i)] for i in np.asarray(sample_idx))

    ids_small = jax.block_until_ready(transform(text_small))
    ref_small = np.array([transform.stoi[s] for s in text_small], dtype=np.int32)
    np.testing.assert_array_equal(np.asarray(ids_small, dtype=np.int32), ref_small)
    assert ids_small.shape == (len(text_small),)
    assert transform.decode(ids_small) == text_small

    # Large input (> 8192 rows) -> pipelined multi-tile grid (2 x 8192 rows).
    text_large = corpus * 20000
    ids_large = jax.block_until_ready(transform(text_large))
    ref_large = np.array([transform.stoi[s] for s in text_large], dtype=np.int32)
    np.testing.assert_array_equal(np.asarray(ids_large, dtype=np.int32), ref_large)

    # Non-ASCII (but single-byte) vocab: exercises the 2x(8,128) LUT kernel.
    transform_l1 = CharTransformJAX(corpus + "éö§µ")
    text_l1 = "Speak§ézµö" * 3
    ids_l1 = jax.block_until_ready(transform_l1(text_l1))
    ref_l1 = np.array([transform_l1.stoi[s] for s in text_l1], dtype=np.int32)
    np.testing.assert_array_equal(np.asarray(ids_l1, dtype=np.int32), ref_l1)

    print("KERNEL_OK")
</pallas_src>

<mosaic_0001>
module attributes {stable_mosaic.version = 11 : i64} {
  func.func @_select_kernel(%arg0: i32, %arg1: memref<32x128xi8, #tpu.memory_space<vmem>>, %arg2: memref<32x128xi8, #tpu.memory_space<vmem>>) attributes {dimension_semantics = [#tpu.dimension_semantics<parallel>], iteration_bounds = array<i64: 1>, scalar_prefetch = 0 : i64, scratch_operands = 0 : i64, tpu.core_type = #tpu.core_type<tc>, window_params = [{transform_indices = @transform_0, window_bounds = array<i64: 32, 128>}, {transform_indices = @transform_1, window_bounds = array<i64: 32, 128>}]} {
    %c0_i32 = arith.constant 0 : i32
    %c32_i32 = arith.constant 32 : i32
    %0 = arith.muli %c0_i32, %c32_i32 : i32
    %1 = tpu.assume_multiple %0, 32 : i32
    %2 = arith.index_cast %1 : i32 to index
    %c0 = arith.constant 0 : index
    %3 = vector.load %arg1[%2, %c0] : memref<32x128xi8, #tpu.memory_space<vmem>>, vector<32x128xi8>
    %4 = arith.extui %3 : vector<32x128xi8> to vector<32x128xi32>
    %c-1_i32 = arith.constant -1 : i32
    %5 = vector.broadcast %c-1_i32 : i32 to vector<32x128xi32>
    %c10_i32 = arith.constant 10 : i32
    %6 = vector.broadcast %c10_i32 : i32 to vector<32x128xi32>
    %7 = arith.cmpi eq, %4, %6 : vector<32x128xi32>
    %c0_i32_0 = arith.constant 0 : i32
    %8 = vector.broadcast %c0_i32_0 : i32 to vector<32x128xi32>
    %9 = arith.select %7, %8, %5 : vector<32x128xi1>, vector<32x128xi32>
    %c32_i32_1 = arith.constant 32 : i32
    %10 = vector.broadcast %c32_i32_1 : i32 to vector<32x128xi32>
    %11 = arith.cmpi eq, %4, %10 : vector<32x128xi32>
    %c1_i32 = arith.constant 1 : i32
    %12 = vector.broadcast %c1_i32 : i32 to vector<32x128xi32>
    %13 = arith.select %11, %12, %9 : vector<32x128xi1>, vector<32x128xi32>
    %c44_i32 = arith.constant 44 : i32
    %14 = vector.broadcast %c44_i32 : i32 to vector<32x128xi32>
    %15 = arith.cmpi eq, %4, %14 : vector<32x128xi32>
    %c2_i32 = arith.constant 2 : i32
    %16 = vector.broadcast %c2_i32 : i32 to vector<32x128xi32>
    %17 = arith.select %15, %16, %13 : vector<32x128xi1>, vector<32x128xi32>
    %c46_i32 = arith.constant 46 : i32
    %18 = vector.broadcast %c46_i32 : i32 to vector<32x128xi32>
    %19 = arith.cmpi eq, %4, %18 : vector<32x128xi32>
    %c3_i32 = arith.constant 3 : i32
    %20 = vector.broadcast %c3_i32 : i32 to vector<32x128xi32>
    %21 = arith.select %19, %20, %17 : vector<32x128xi1>, vector<32x128xi32>
    %c58_i32 = arith.constant 58 : i32
    %22 = vector.broadcast %c58_i32 : i32 to vector<32x128xi32>
    %23 = arith.cmpi eq, %4, %22 : vector<32x128xi32>
    %c4_i32 = arith.constant 4 : i32
    %24 = vector.broadcast %c4_i32 : i32 to vector<32x128xi32>
    %25 = arith.select %23, %24, %21 : vector<32x128xi1>, vector<32x128xi32>
    %c65_i32 = arith.constant 65 : i32
    %26 = vector.broadcast %c65_i32 : i32 to vector<32x128xi32>
    %27 = arith.cmpi eq, %4, %26 : vector<32x128xi32>
    %c5_i32 = arith.constant 5 : i32
    %28 = vector.broadcast %c5_i32 : i32 to vector<32x128xi32>
    %29 = arith.select %27, %28, %25 : vector<32x128xi1>, vector<32x128xi32>
    %c66_i32 = arith.constant 66 : i32
    %30 = vector.broadcast %c66_i32 : i32 to vector<32x128xi32>
    %31 = arith.cmpi eq, %4, %30 : vector<32x128xi32>
    %c6_i32 = arith.constant 6 : i32
    %32 = vector.broadcast %c6_i32 : i32 to vector<32x128xi32>
    %33 = arith.select %31, %32, %29 : vector<32x128xi1>, vector<32x128xi32>
    %c67_i32 = arith.constant 67 : i32
    %34 = vector.broadcast %c67_i32 : i32 to vector<32x128xi32>
    %35 = arith.cmpi eq, %4, %34 : vector<32x128xi32>
    %c7_i32 = arith.constant 7 : i32
    %36 = vector.broadcast %c7_i32 : i32 to vector<32x128xi32>
    %37 = arith.select %35, %36, %33 : vector<32x128xi1>, vector<32x128xi32>
    %c70_i32 = arith.constant 70 : i32
    %38 = vector.broadcast %c70_i32 : i32 to vector<32x128xi32>
    %39 = arith.cmpi eq, %4, %38 : vector<32x128xi32>
    %c8_i32 = arith.constant 8 : i32
    %40 = vector.broadcast %c8_i32 : i32 to vector<32x128xi32>
    %41 = arith.select %39, %40, %37 : vector<32x128xi1>, vector<32x128xi32>
    %c83_i32 = arith.constant 83 : i32
    %42 = vector.broadcast %c83_i32 : i32 to vector<32x128xi32>
    %43 = arith.cmpi eq, %4, %42 : vector<32x128xi32>
    %c9_i32 = arith.constant 9 : i32
    %44 = vector.broadcast %c9_i32 : i32 to vector<32x128xi32>
    %45 = arith.select %43, %44, %41 : vector<32x128xi1>, vector<32x128xi32>
    %c97_i32 = arith.constant 97 : i32
    %46 = vector.broadcast %c97_i32 : i32 to vector<32x128xi32>
    %47 = arith.cmpi eq, %4, %46 : vector<32x128xi32>
    %c10_i32_2 = arith.constant 10 : i32
    %48 = vector.broadcast %c10_i32_2 : i32 to vector<32x128xi32>
    %49 = arith.select %47, %48, %45 : vector<32x128xi1>, vector<32x128xi32>
    %c99_i32 = arith.constant 99 : i32
    %50 = vector.broadcast %c99_i32 : i32 to vector<32x128xi32>
    %51 = arith.cmpi eq, %4, %50 : vector<32x128xi32>
    %c11_i32 = arith.constant 11 : i32
    %52 = vector.broadcast %c11_i32 : i32 to vector<32x128xi32>
    %53 = arith.select %51, %52, %49 : vector<32x128xi1>, vector<32x128xi32>
    %c100_i32 = arith.constant 100 : i32
    %54 = vector.broadcast %c100_i32 : i32 to vector<32x128xi32>
    %55 = arith.cmpi eq, %4, %54 : vector<32x128xi32>
    %c12_i32 = arith.constant 12 : i32
    %56 = vector.broadcast %c12_i32 : i32 to vector<32x128xi32>
    %57 = arith.select %55, %56, %53 : vector<32x128xi1>, vector<32x128xi32>
    %c101_i32 = arith.constant 101 : i32
    %58 = vector.broadcast %c101_i32 : i32 to vector<32x128xi32>
    %59 = arith.cmpi eq, %4, %58 : vector<32x128xi32>
    %c13_i32 = arith.constant 13 : i32
    %60 = vector.broadcast %c13_i32 : i32 to vector<32x128xi32>
    %61 = arith.select %59, %60, %57 : vector<32x128xi1>, vector<32x128xi32>
    %c102_i32 = arith.constant 102 : i32
    %62 = vector.broadcast %c102_i32 : i32 to vector<32x128xi32>
    %63 = arith.cmpi eq, %4, %62 : vector<32x128xi32>
    %c14_i32 = arith.constant 14 : i32
    %64 = vector.broadcast %c14_i32 : i32 to vector<32x128xi32>
    %65 = arith.select %63, %64, %61 : vector<32x128xi1>, vector<32x128xi32>
    %c104_i32 = arith.constant 104 : i32
    %66 = vector.broadcast %c104_i32 : i32 to vector<32x128xi32>
    %67 = arith.cmpi eq, %4, %66 : vector<32x128xi32>
    %c15_i32 = arith.constant 15 : i32
    %68 = vector.broadcast %c15_i32 : i32 to vector<32x128xi32>
    %69 = arith.select %67, %68, %65 : vector<32x128xi1>, vector<32x128xi32>
    %c105_i32 = arith.constant 105 : i32
    %70 = vector.broadcast %c105_i32 : i32 to vector<32x128xi32>
    %71 = arith.cmpi eq, %4, %70 : vector<32x128xi32>
    %c16_i32 = arith.constant 16 : i32
    %72 = vector.broadcast %c16_i32 : i32 to vector<32x128xi32>
    %73 = arith.select %71, %72, %69 : vector<32x128xi1>, vector<32x128xi32>
    %c107_i32 = arith.constant 107 : i32
    %74 = vector.broadcast %c107_i32 : i32 to vector<32x128xi32>
    %75 = arith.cmpi eq, %4, %74 : vector<32x128xi32>
    %c17_i32 = arith.constant 17 : i32
    %76 = vector.broadcast %c17_i32 : i32 to vector<32x128xi32>
    %77 = arith.select %75, %76, %73 : vector<32x128xi1>, vector<32x128xi32>
    %c108_i32 = arith.constant 108 : i32
    %78 = vector.broadcast %c108_i32 : i32 to vector<32x128xi32>
    %79 = arith.cmpi eq, %4, %78 : vector<32x128xi32>
    %c18_i32 = arith.constant 18 : i32
    %80 = vector.broadcast %c18_i32 : i32 to vector<32x128xi32>
    %81 = arith.select %79, %80, %77 : vector<32x128xi1>, vector<32x128xi32>
    %c109_i32 = arith.constant 109 : i32
    %82 = vector.broadcast %c109_i32 : i32 to vector<32x128xi32>
    %83 = arith.cmpi eq, %4, %82 : vector<32x128xi32>
    %c19_i32 = arith.constant 19 : i32
    %84 = vector.broadcast %c19_i32 : i32 to vector<32x128xi32>
    %85 = arith.select %83, %84, %81 : vector<32x128xi1>, vector<32x128xi32>
    %c110_i32 = arith.constant 110 : i32
    %86 = vector.broadcast %c110_i32 : i32 to vector<32x128xi32>
    %87 = arith.cmpi eq, %4, %86 : vector<32x128xi32>
    %c20_i32 = arith.constant 20 : i32
    %88 = vector.broadcast %c20_i32 : i32 to vector<32x128xi32>
    %89 = arith.select %87, %88, %85 : vector<32x128xi1>, vector<32x128xi32>
    %c111_i32 = arith.constant 111 : i32
    %90 = vector.broadcast %c111_i32 : i32 to vector<32x128xi32>
    %91 = arith.cmpi eq, %4, %90 : vector<32x128xi32>
    %c21_i32 = arith.constant 21 : i32
    %92 = vector.broadcast %c21_i32 : i32 to vector<32x128xi32>
    %93 = arith.select %91, %92, %89 : vector<32x128xi1>, vector<32x128xi32>
    %c112_i32 = arith.constant 112 : i32
    %94 = vector.broadcast %c112_i32 : i32 to vector<32x128xi32>
    %95 = arith.cmpi eq, %4, %94 : vector<32x128xi32>
    %c22_i32 = arith.constant 22 : i32
    %96 = vector.broadcast %c22_i32 : i32 to vector<32x128xi32>
    %97 = arith.select %95, %96, %93 : vector<32x128xi1>, vector<32x128xi32>
    %c114_i32 = arith.constant 114 : i32
    %98 = vector.broadcast %c114_i32 : i32 to vector<32x128xi32>
    %99 = arith.cmpi eq, %4, %98 : vector<32x128xi32>
    %c23_i32 = arith.constant 23 : i32
    %100 = vector.broadcast %c23_i32 : i32 to vector<32x128xi32>
    %101 = arith.select %99, %100, %97 : vector<32x128xi1>, vector<32x128xi32>
    %c115_i32 = arith.constant 115 : i32
    %102 = vector.broadcast %c115_i32 : i32 to vector<32x128xi32>
    %103 = arith.cmpi eq, %4, %102 : vector<32x128xi32>
    %c24_i32 = arith.constant 24 : i32
    %104 = vector.broadcast %c24_i32 : i32 to vector<32x128xi32>
    %105 = arith.select %103, %104, %101 : vector<32x128xi1>, vector<32x128xi32>
    %c116_i32 = arith.constant 116 : i32
    %106 = vector.broadcast %c116_i32 : i32 to vector<32x128xi32>
    %107 = arith.cmpi eq, %4, %106 : vector<32x128xi32>
    %c25_i32 = arith.constant 25 : i32
    %108 = vector.broadcast %c25_i32 : i32 to vector<32x128xi32>
    %109 = arith.select %107, %108, %105 : vector<32x128xi1>, vector<32x128xi32>
    %c117_i32 = arith.constant 117 : i32
    %110 = vector.broadcast %c117_i32 : i32 to vector<32x128xi32>
    %111 = arith.cmpi eq, %4, %110 : vector<32x128xi32>
    %c26_i32 = arith.constant 26 : i32
    %112 = vector.broadcast %c26_i32 : i32 to vector<32x128xi32>
    %113 = arith.select %111, %112, %109 : vector<32x128xi1>, vector<32x128xi32>
    %c119_i32 = arith.constant 119 : i32
    %114 = vector.broadcast %c119_i32 : i32 to vector<32x128xi32>
    %115 = arith.cmpi eq, %4, %114 : vector<32x128xi32>
    %c27_i32 = arith.constant 27 : i32
    %116 = vector.broadcast %c27_i32 : i32 to vector<32x128xi32>
    %117 = arith.select %115, %116, %113 : vector<32x128xi1>, vector<32x128xi32>
    %c121_i32 = arith.constant 121 : i32
    %118 = vector.broadcast %c121_i32 : i32 to vector<32x128xi32>
    %119 = arith.cmpi eq, %4, %118 : vector<32x128xi32>
    %c28_i32 = arith.constant 28 : i32
    %120 = vector.broadcast %c28_i32 : i32 to vector<32x128xi32>
    %121 = arith.select %119, %120, %117 : vector<32x128xi1>, vector<32x128xi32>
    %c122_i32 = arith.constant 122 : i32
    %122 = vector.broadcast %c122_i32 : i32 to vector<32x128xi32>
    %123 = arith.cmpi eq, %4, %122 : vector<32x128xi32>
    %c29_i32 = arith.constant 29 : i32
    %124 = vector.broadcast %c29_i32 : i32 to vector<32x128xi32>
    %125 = arith.select %123, %124, %121 : vector<32x128xi1>, vector<32x128xi32>
    %126 = arith.trunci %125 : vector<32x128xi32> to vector<32x128xi8>
    %127 = arith.index_cast %1 : i32 to index
    %c0_3 = arith.constant 0 : index
    %128 = vector.load %arg2[%127, %c0_3] : memref<32x128xi8, #tpu.memory_space<vmem>>, vector<32x128xi8>
    tpu.vector_store %arg2[%127, %c0_3], %126 {strides = array<i32>} : memref<32x128xi8, #tpu.memory_space<vmem>>, vector<32x128xi8>,
    %c1_i32_4 = arith.constant 1 : i32
    return
  }
  func.func @transform_0(%arg0: i32) -> (i32, i32) {
    %c0_i32 = arith.constant 0 : i32
    %c0_i32_0 = arith.constant 0 : i32
    return %arg0, %c0_i32 : i32, i32
  }
  func.func @transform_1(%arg0: i32) -> (i32, i32) {
    %c0_i32 = arith.constant 0 : i32
    %c0_i32_0 = arith.constant 0 : i32
    return %arg0, %c0_i32 : i32, i32
  }
}

</mosaic_0001>

<bundles_post_ra>
// kernel: tpu_custom_call.1
= control target key start
LH: loop header
LB: loop body
LE: loop exit
PB: predicated region body
PF: predicated region fallthrough
CT: control target
= control target key end

     0   :  { %6 = vsyncpa [#allocation3], 0  ;;  %s495_s0 = inlined_call_operand.hbm [shape: u8[32,128], index: 0, kind: input, shape index: {}]   ;;  %s496_s1 = inlined_call_operand.hbm [shape: s8[32,128], index: 1, kind: output, shape index: {}]  }
   0x1   :  { %7 = vsyncpa [#allocation4], 0  ;;  %s13_s8 = sshll.u32 %s495_s0, 4  ;;  %s348_s9 = smov [#allocation2]   ;;  %s14_s8 = int_to_ptr.hbm [resolvable:$true] %s13_s8 }
   0x2   :  { %s15_s10 = sshll.u32 %s348_s9, 4  ;;  %s16_s10 = int_to_ptr.vmem [resolvable:$true] %s15_s10 }
   0x3   :  { %18 = dma.hbm_to_vmem [thread:$0]  %s14_s8, 128, %s16_s10, [#allocation3]  }
   0x4   :  { %344 = dma.done.wait [#allocation3], 128  }
   0x5   :  { %345 = vsyncadd [#allocation3], 4294967168  ;;  %v23_v0 = vld [vmem:[#allocation2] sm:$0xff]  ;;  %v349_v9 = vmov 4294967295   ;;  %s350_s0 = smov [#allocation5]   ;;  %s283_s14 = sshll.u32 %s496_s1, 4  ;;  %s284_s14 = int_to_ptr.hbm [resolvable:$true] %s283_s14 }
   0x6   :  { %v24_v1 = vunpack.c.0.s8 %v23_v0  ;;  %v25_v2 = vunpack.c.1.s8 %v23_v0  ;;  %v26_v3 = vunpack.c.2.s8 %v23_v0  ;;  %v27_v4 = vunpack.c.3.s8 %v23_v0  ;;  %s281_s11 = sshll.u32 %s350_s0, 4  ;;  %s282_s11 = int_to_ptr.vmem [resolvable:$true] %s281_s11 }
   0x8   :  { %v364_v5 = vand.u32 255, %v24_v1  ;;  %v366_v6 = vand.u32 255, %v25_v2  ;;  %v368_v7 = vand.u32 255, %v26_v3  ;;  %v370_v8 = vand.u32 255, %v27_v4 }
   0xa   :  { %vm32_vm0 = vcmp.eq.s32.totalorder %v364_v5, 10  ;;  %vm33_vm1 = vcmp.eq.s32.totalorder %v366_v6, 10  ;;  %vm34_vm2 = vcmp.eq.s32.totalorder %v368_v7, 10  ;;  %vm35_vm3 = vcmp.eq.s32.totalorder %v370_v8, 10 }
   0xb   :  { %v36_v10 = vsel %vm32_vm0, 0, %v349_v9  ;;  %v37_v11 = vsel %vm33_vm1, 0, %v349_v9  ;;  %v38_v12 = vsel %vm34_vm2, 0, %v349_v9  ;;  %v39_v13 = vsel %vm35_vm3, 0, %v349_v9 }
   0xc   :  { %vm40_vm4 = vcmp.eq.s32.totalorder %v364_v5, 32  ;;  %vm41_vm5 = vcmp.eq.s32.totalorder %v366_v6, 32  ;;  %vm42_vm6 = vcmp.eq.s32.totalorder %v368_v7, 32  ;;  %vm43_vm7 = vcmp.eq.s32.totalorder %v370_v8, 32 }
   0xd   :  { %v44_v14 = vsel %vm40_vm4, 1, %v36_v10  ;;  %v45_v15 = vsel %vm41_vm5, 1, %v37_v11  ;;  %v46_v16 = vsel %vm42_vm6, 1, %v38_v12  ;;  %v47_v17 = vsel %vm43_vm7, 1, %v39_v13 }
   0xe   :  { %vm48_vm8 = vcmp.eq.s32.totalorder %v364_v5, 44  ;;  %vm49_vm9 = vcmp.eq.s32.totalorder %v366_v6, 44  ;;  %vm50_vm10 = vcmp.eq.s32.totalorder %v368_v7, 44  ;;  %vm51_vm11 = vcmp.eq.s32.totalorder %v370_v8, 44 }
   0xf   :  { %v52_v18 = vsel %vm48_vm8, 2, %v44_v14  ;;  %v53_v19 = vsel %vm49_vm9, 2, %v45_v15  ;;  %v54_v20 = vsel %vm50_vm10, 2, %v46_v16  ;;  %v55_v21 = vsel %vm51_vm11, 2, %v47_v17 }
  0x10   :  { %vm56_vm12 = vcmp.eq.s32.totalorder %v364_v5, 46  ;;  %vm57_vm13 = vcmp.eq.s32.totalorder %v366_v6, 46  ;;  %vm58_vm14 = vcmp.eq.s32.totalorder %v368_v7, 46  ;;  %vm59_vm15 = vcmp.eq.s32.totalorder %v370_v8, 46 }
  0x11   :  { %v60_v22 = vsel %vm56_vm12, 3, %v52_v18  ;;  %v61_v23 = vsel %vm57_vm13, 3, %v53_v19  ;;  %v62_v24 = vsel %vm58_vm14, 3, %v54_v20  ;;  %v63_v25 = vsel %vm59_vm15, 3, %v55_v21 }
  0x12   :  { %vm64_vm0 = vcmp.eq.s32.totalorder %v364_v5, 58  ;;  %vm65_vm1 = vcmp.eq.s32.totalorder %v366_v6, 58  ;;  %vm66_vm2 = vcmp.eq.s32.totalorder %v368_v7, 58  ;;  %vm67_vm3 = vcmp.eq.s32.totalorder %v370_v8, 58 }
  0x13   :  { %v68_v26 = vsel %vm64_vm0, 4, %v60_v22  ;;  %v69_v27 = vsel %vm65_vm1, 4, %v61_v23  ;;  %v70_v28 = vsel %vm66_vm2, 4, %v62_v24  ;;  %v71_v29 = vsel %vm67_vm3, 4, %v63_v25 }
  0x14   :  { %vm72_vm4 = vcmp.eq.s32.totalorder %v364_v5, 65  ;;  %vm73_vm5 = vcmp.eq.s32.totalorder %v366_v6, 65  ;;  %vm74_vm6 = vcmp.eq.s32.totalorder %v368_v7, 65  ;;  %vm75_vm7 = vcmp.eq.s32.totalorder %v370_v8, 65 }
  0x15   :  { %v76_v30 = vsel %vm72_vm4, 5, %v68_v26  ;;  %v77_v31 = vsel %vm73_vm5, 5, %v69_v27  ;;  %v78_v32 = vsel %vm74_vm6, 5, %v70_v28  ;;  %v79_v33 = vsel %vm75_vm7, 5, %v71_v29 }
  0x16   :  { %vm80_vm8 = vcmp.eq.s32.totalorder %v364_v5, 66  ;;  %vm81_vm9 = vcmp.eq.s32.totalorder %v366_v6, 66  ;;  %vm82_vm10 = vcmp.eq.s32.totalorder %v368_v7, 66  ;;  %vm83_vm11 = vcmp.eq.s32.totalorder %v370_v8, 66 }
  0x17   :  { %v84_v34 = vsel %vm80_vm8, 6, %v76_v30  ;;  %v85_v35 = vsel %vm81_vm9, 6, %v77_v31  ;;  %v86_v36 = vsel %vm82_vm10, 6, %v78_v32  ;;  %v87_v37 = vsel %vm83_vm11, 6, %v79_v33 }
  0x18   :  { %vm88_vm12 = vcmp.eq.s32.totalorder %v364_v5, 67  ;;  %vm89_vm13 = vcmp.eq.s32.totalorder %v366_v6, 67  ;;  %vm90_vm14 = vcmp.eq.s32.totalorder %v368_v7, 67  ;;  %vm91_vm15 = vcmp.eq.s32.totalorder %v370_v8, 67 }
  0x19   :  { %v92_v38 = vsel %vm88_vm12, 7, %v84_v34  ;;  %v93_v39 = vsel %vm89_vm13, 7, %v85_v35  ;;  %v94_v40 = vsel %vm90_vm14, 7, %v86_v36  ;;  %v95_v41 = vsel %vm91_vm15, 7, %v87_v37 }
  0x1a   :  { %vm96_vm0 = vcmp.eq.s32.totalorder %v364_v5, 70  ;;  %vm97_vm1 = vcmp.eq.s32.totalorder %v366_v6, 70  ;;  %vm98_vm2 = vcmp.eq.s32.totalorder %v368_v7, 70  ;;  %vm99_vm3 = vcmp.eq.s32.totalorder %v370_v8, 70 }
  0x1b   :  { %v100_v42 = vsel %vm96_vm0, 8, %v92_v38  ;;  %v101_v43 = vsel %vm97_vm1, 8, %v93_v39  ;;  %v102_v44 = vsel %vm98_vm2, 8, %v94_v40  ;;  %v103_v45 = vsel %vm99_vm3, 8, %v95_v41 }
  0x1c   :  { %vm104_vm4 = vcmp.eq.s32.totalorder %v364_v5, 83  ;;  %vm105_vm5 = vcmp.eq.s32.totalorder %v366_v6, 83  ;;  %vm106_vm6 = vcmp.eq.s32.totalorder %v368_v7, 83  ;;  %vm107_vm7 = vcmp.eq.s32.totalorder %v370_v8, 83 }
  0x1d   :  { %v108_v46 = vsel %vm104_vm4, 9, %v100_v42  ;;  %v109_v47 = vsel %vm105_vm5, 9, %v101_v43  ;;  %v110_v48 = vsel %vm106_vm6, 9, %v102_v44  ;;  %v111_v49 = vsel %vm107_vm7, 9, %v103_v45 }
  0x1e   :  { %vm112_vm8 = vcmp.eq.s32.totalorder %v364_v5, 97  ;;  %vm113_vm9 = vcmp.eq.s32.totalorder %v366_v6, 97  ;;  %vm114_vm10 = vcmp.eq.s32.totalorder %v368_v7, 97  ;;  %vm115_vm11 = vcmp.eq.s32.totalorder %v370_v8, 97 }
  0x1f   :  { %v116_v50 = vsel %vm112_vm8, 10, %v108_v46  ;;  %v117_v51 = vsel %vm113_vm9, 10, %v109_v47  ;;  %v118_v52 = vsel %vm114_vm10, 10, %v110_v48  ;;  %v119_v53 = vsel %vm115_vm11, 10, %v111_v49 }
  0x20   :  { %vm120_vm12 = vcmp.eq.s32.totalorder %v364_v5, 99  ;;  %vm121_vm13 = vcmp.eq.s32.totalorder %v366_v6, 99  ;;  %vm122_vm14 = vcmp.eq.s32.totalorder %v368_v7, 99  ;;  %vm123_vm15 = vcmp.eq.s32.totalorder %v370_v8, 99 }
  0x21   :  { %v124_v54 = vsel %vm120_vm12, 11, %v116_v50  ;;  %v125_v55 = vsel %vm121_vm13, 11, %v117_v51  ;;  %v126_v56 = vsel %vm122_vm14, 11, %v118_v52  ;;  %v127_v57 = vsel %vm123_vm15, 11, %v119_v53 }
  0x22   :  { %vm128_vm0 = vcmp.eq.s32.totalorder %v364_v5, 100  ;;  %vm129_vm1 = vcmp.eq.s32.totalorder %v366_v6, 100  ;;  %vm130_vm2 = vcmp.eq.s32.totalorder %v368_v7, 100  ;;  %vm131_vm3 = vcmp.eq.s32.totalorder %v370_v8, 100 }
  0x23   :  { %v132_v58 = vsel %vm128_vm0, 12, %v124_v54  ;;  %v133_v59 = vsel %vm129_vm1, 12, %v125_v55  ;;  %v134_v60 = vsel %vm130_vm2, 12, %v126_v56  ;;  %v135_v61 = vsel %vm131_vm3, 12, %v127_v57 }
  0x24   :  { %vm136_vm4 = vcmp.eq.s32.totalorder %v364_v5, 101  ;;  %vm137_vm5 = vcmp.eq.s32.totalorder %v366_v6, 101  ;;  %vm138_vm6 = vcmp.eq.s32.totalorder %v368_v7, 101  ;;  %vm139_vm7 = vcmp.eq.s32.totalorder %v370_v8, 101 }
  0x25   :  { %v140_v62 = vsel %vm136_vm4, 13, %v132_v58  ;;  %v141_v63 = vsel %vm137_vm5, 13, %v133_v59  ;;  %v142_v0 = vsel %vm138_vm6, 13, %v134_v60  ;;  %v143_v1 = vsel %vm139_vm7, 13, %v135_v61 }
  0x26   :  { %vm144_vm8 = vcmp.eq.s32.totalorder %v364_v5, 102  ;;  %vm145_vm9 = vcmp.eq.s32.totalorder %v366_v6, 102  ;;  %vm146_vm10 = vcmp.eq.s32.totalorder %v368_v7, 102  ;;  %vm147_vm11 = vcmp.eq.s32.totalorder %v370_v8, 102 }
  0x27   :  { %v148_v2 = vsel %vm144_vm8, 14, %v140_v62  ;;  %v149_v3 = vsel %vm145_vm9, 14, %v141_v63  ;;  %v150_v4 = vsel %vm146_vm10, 14, %v142_v0  ;;  %v151_v9 = vsel %vm147_vm11, 14, %v143_v1 }
  0x28   :  { %vm152_vm12 = vcmp.eq.s32.totalorder %v364_v5, 104  ;;  %vm153_vm13 = vcmp.eq.s32.totalorder %v366_v6, 104  ;;  %vm154_vm14 = vcmp.eq.s32.totalorder %v368_v7, 104  ;;  %vm155_vm15 = vcmp.eq.s32.totalorder %v370_v8, 104 }
  0x29   :  { %v156_v10 = vsel %vm152_vm12, 15, %v148_v2  ;;  %v157_v11 = vsel %vm153_vm13, 15, %v149_v3  ;;  %v158_v12 = vsel %vm154_vm14, 15, %v150_v4  ;;  %v159_v13 = vsel %vm155_vm15, 15, %v151_v9 }
  0x2a   :  { %vm160_vm0 = vcmp.eq.s32.totalorder %v364_v5, 105  ;;  %vm161_vm1 = vcmp.eq.s32.totalorder %v366_v6, 105  ;;  %vm162_vm2 = vcmp.eq.s32.totalorder %v368_v7, 105  ;;  %vm163_vm3 = vcmp.eq.s32.totalorder %v370_v8, 105 }
  0x2b   :  { %v164_v14 = vsel %vm160_vm0, 16, %v156_v10  ;;  %v165_v15 = vsel %vm161_vm1, 16, %v157_v11  ;;  %v166_v16 = vsel %vm162_vm2, 16, %v158_v12  ;;  %v167_v17 = vsel %vm163_vm3, 16, %v159_v13 }
  0x2c   :  { %vm168_vm4 = vcmp.eq.s32.totalorder %v364_v5, 107  ;;  %vm169_vm5 = vcmp.eq.s32.totalorder %v366_v6, 107  ;;  %vm170_vm6 = vcmp.eq.s32.totalorder %v368_v7, 107  ;;  %vm171_vm7 = vcmp.eq.s32.totalorder %v370_v8, 107 }
  0x2d   :  { %v172_v18 = vsel %vm168_vm4, 17, %v164_v14  ;;  %v173_v19 = vsel %vm169_vm5, 17, %v165_v15  ;;  %v174_v20 = vsel %vm170_vm6, 17, %v166_v16  ;;  %v175_v21 = vsel %vm171_vm7, 17, %v167_v17 }
  0x2e   :  { %vm176_vm8 = vcmp.eq.s32.totalorder %v364_v5, 108  ;;  %vm177_vm9 = vcmp.eq.s32.totalorder %v366_v6, 108  ;;  %vm178_vm10 = vcmp.eq.s32.totalorder %v368_v7, 108  ;;  %vm179_vm11 = vcmp.eq.s32.totalorder %v370_v8, 108 }
  0x2f   :  { %v180_v22 = vsel %vm176_vm8, 18, %v172_v18  ;;  %v181_v23 = vsel %vm177_vm9, 18, %v173_v19  ;;  %v182_v24 = vsel %vm178_vm10, 18, %v174_v20  ;;  %v183_v25 = vsel %vm179_vm11, 18, %v175_v21 }
  0x30   :  { %vm184_vm12 = vcmp.eq.s32.totalorder %v364_v5, 109  ;;  %vm185_vm13 = vcmp.eq.s32.totalorder %v366_v6, 109  ;;  %vm186_vm14 = vcmp.eq.s32.totalorder %v368_v7, 109  ;;  %vm187_vm15 = vcmp.eq.s32.totalorder %v370_v8, 109 }
  0x31   :  { %v188_v26 = vsel %vm184_vm12, 19, %v180_v22  ;;  %v189_v27 = vsel %vm185_vm13, 19, %v181_v23  ;;  %v190_v28 = vsel %vm186_vm14, 19, %v182_v24  ;;  %v191_v29 = vsel %vm187_vm15, 19, %v183_v25 }
  0x32   :  { %vm192_vm0 = vcmp.eq.s32.totalorder %v364_v5, 110  ;;  %vm193_vm1 = vcmp.eq.s32.totalorder %v366_v6, 110  ;;  %vm194_vm2 = vcmp.eq.s32.totalorder %v368_v7, 110  ;;  %vm195_vm3 = vcmp.eq.s32.totalorder %v370_v8, 110 }
  0x33   :  { %v196_v30 = vsel %vm192_vm0, 20, %v188_v26  ;;  %v197_v31 = vsel %vm193_vm1, 20, %v189_v27  ;;  %v198_v32 = vsel %vm194_vm2, 20, %v190_v28  ;;  %v199_v33 = vsel %vm195_vm3, 20, %v191_v29 }
  0x34   :  { %vm200_vm4 = vcmp.eq.s32.totalorder %v364_v5, 111  ;;  %vm201_vm5 = vcmp.eq.s32.totalorder %v366_v6, 111  ;;  %vm202_vm6 = vcmp.eq.s32.totalorder %v368_v7, 111  ;;  %vm203_vm7 = vcmp.eq.s32.totalorder %v370_v8, 111 }
  0x35   :  { %v204_v34 = vsel %vm200_vm4, 21, %v196_v30  ;;  %v205_v35 = vsel %vm201_vm5, 21, %v197_v31  ;;  %v206_v36 = vsel %vm202_vm6, 21, %v198_v32  ;;  %v207_v37 = vsel %vm203_vm7, 21, %v199_v33 }
  0x36   :  { %vm208_vm8 = vcmp.eq.s32.totalorder %v364_v5, 112  ;;  %vm209_vm9 = vcmp.eq.s32.totalorder %v366_v6, 112  ;;  %vm210_vm10 = vcmp.eq.s32.totalorder %v368_v7, 112  ;;  %vm211_vm11 = vcmp.eq.s32.totalorder %v370_v8, 112 }
  0x37   :  { %v212_v38 = vsel %vm208_vm8, 22, %v204_v34  ;;  %v213_v39 = vsel %vm209_vm9, 22, %v205_v35  ;;  %v214_v40 = vsel %vm210_vm10, 22, %v206_v36  ;;  %v215_v41 = vsel %vm211_vm11, 22, %v207_v37 }
  0x38   :  { %vm216_vm12 = vcmp.eq.s32.totalorder %v364_v5, 114  ;;  %vm217_vm13 = vcmp.eq.s32.totalorder %v366_v6, 114  ;;  %vm218_vm14 = vcmp.eq.s32.totalorder %v368_v7, 114  ;;  %vm219_vm15 = vcmp.eq.s32.totalorder %v370_v8, 114 }
  0x39   :  { %v220_v42 = vsel %vm216_vm12, 23, %v212_v38  ;;  %v221_v43 = vsel %vm217_vm13, 23, %v213_v39  ;;  %v222_v44 = vsel %vm218_vm14, 23, %v214_v40  ;;  %v223_v45 = vsel %vm219_vm15, 23, %v215_v41 }
  0x3a   :  { %vm224_vm0 = vcmp.eq.s32.totalorder %v364_v5, 115  ;;  %vm225_vm1 = vcmp.eq.s32.totalorder %v366_v6, 115  ;;  %vm226_vm2 = vcmp.eq.s32.totalorder %v368_v7, 115  ;;  %vm227_vm3 = vcmp.eq.s32.totalorder %v370_v8, 115 }
  0x3b   :  { %v228_v46 = vsel %vm224_vm0, 24, %v220_v42  ;;  %v229_v47 = vsel %vm225_vm1, 24, %v221_v43  ;;  %v230_v48 = vsel %vm226_vm2, 24, %v222_v44  ;;  %v231_v49 = vsel %vm227_vm3, 24, %v223_v45 }
  0x3c   :  { %vm232_vm4 = vcmp.eq.s32.totalorder %v364_v5, 116  ;;  %vm233_vm5 = vcmp.eq.s32.totalorder %v366_v6, 116  ;;  %vm234_vm6 = vcmp.eq.s32.totalorder %v368_v7, 116  ;;  %vm235_vm7 = vcmp.eq.s32.totalorder %v370_v8, 116 }
  0x3d   :  { %v236_v50 = vsel %vm232_vm4, 25, %v228_v46  ;;  %v237_v51 = vsel %vm233_vm5, 25, %v229_v47  ;;  %v238_v52 = vsel %vm234_vm6, 25, %v230_v48  ;;  %v239_v53 = vsel %vm235_vm7, 25, %v231_v49 }
  0x3e   :  { %vm240_vm8 = vcmp.eq.s32.totalorder %v364_v5, 117  ;;  %vm241_vm9 = vcmp.eq.s32.totalorder %v366_v6, 117  ;;  %vm242_vm10 = vcmp.eq.s32.totalorder %v368_v7, 117  ;;  %vm243_vm11 = vcmp.eq.s32.totalorder %v370_v8, 117 }
  0x3f   :  { %v244_v54 = vsel %vm240_vm8, 26, %v236_v50  ;;  %v245_v55 = vsel %vm241_vm9, 26, %v237_v51  ;;  %v246_v56 = vsel %vm242_vm10, 26, %v238_v52  ;;  %v247_v57 = vsel %vm243_vm11, 26, %v239_v53 }
  0x40   :  { %vm248_vm12 = vcmp.eq.s32.totalorder %v364_v5, 119  ;;  %vm249_vm13 = vcmp.eq.s32.totalorder %v366_v6, 119  ;;  %vm250_vm14 = vcmp.eq.s32.totalorder %v368_v7, 119  ;;  %vm251_vm15 = vcmp.eq.s32.totalorder %v370_v8, 119 }
  0x41   :  { %v252_v58 = vsel %vm248_vm12, 27, %v244_v54  ;;  %v253_v59 = vsel %vm249_vm13, 27, %v245_v55  ;;  %v254_v60 = vsel %vm250_vm14, 27, %v246_v56  ;;  %v255_v61 = vsel %vm251_vm15, 27, %v247_v57 }
  0x42   :  { %vm256_vm0 = vcmp.eq.s32.totalorder %v364_v5, 121  ;;  %vm257_vm1 = vcmp.eq.s32.totalorder %v366_v6, 121  ;;  %vm258_vm2 = vcmp.eq.s32.totalorder %v368_v7, 121  ;;  %vm259_vm3 = vcmp.eq.s32.totalorder %v370_v8, 121 }
  0x43   :  { %v260_v62 = vsel %vm256_vm0, 28, %v252_v58  ;;  %v261_v63 = vsel %vm257_vm1, 28, %v253_v59  ;;  %v262_v0 = vsel %vm258_vm2, 28, %v254_v60  ;;  %v263_v1 = vsel %vm259_vm3, 28, %v255_v61 }
  0x44   :  { %vm264_vm4 = vcmp.eq.s32.totalorder %v364_v5, 122  ;;  %vm265_vm5 = vcmp.eq.s32.totalorder %v366_v6, 122  ;;  %vm266_vm6 = vcmp.eq.s32.totalorder %v368_v7, 122  ;;  %vm267_vm7 = vcmp.eq.s32.totalorder %v370_v8, 122 }
  0x45   :  { %v268_v2 = vsel %vm264_vm4, 29, %v260_v62  ;;  %v269_v3 = vsel %vm265_vm5, 29, %v261_v63  ;;  %v270_v4 = vsel %vm266_vm6, 29, %v262_v0  ;;  %v271_v9 = vsel %vm267_vm7, 29, %v263_v1 }
  0x46   :  { %v272_v10 = vpack.c.b16 %v269_v3, %v268_v2  ;;  %v273_v11 = vpack.c.b16 %v271_v9, %v270_v4 }
  0x48   :  { %v274_v12 = vpack.c.b8 %v273_v11, %v272_v10 }
  0x4a   :  { %275 = vst [vmem:[#allocation5] sm:$0xff] %v274_v12 }
  0x4b   :  { %286 = dma.vmem_to_hbm [thread:$0]  %s282_s11, 128, %s284_s14, [#allocation4]  }
  0x4c   :  { %346 = dma.done.wait [#allocation4], 128  }
  0x4d   :  { %347 = vsyncadd [#allocation4], 4294967168 }
  0x4e   :  { %291 = vsyncpa [#allocation3], 1 }
  0x4f   :  { %292 = vsyncpa [#allocation4], 1 }

</bundles_post_ra>
